<compile_context>
chip_gen: v7x
topology: tpu7x:2x2x1
jax: 0.10.0
libtpu: 0.0.40
codegen_flags: <defaults>
</compile_context>

<pallas_src>
import jax
import jax.numpy as jnp
from jax.experimental import pallas as pl
from jax.experimental.pallas import tpu as pltpu


def _round_up(x, m):
    return (x + m - 1) // m * m


def _mlp_encoder_kernel(x_ref, w1_ref, b1_ref, wh_ref, bh_ref, out_ref):
    # fc1 + ReLU: MXU matmul with f32 accumulation, bias/ReLU on the VPU.
    h = jnp.dot(x_ref[...], w1_ref[...], preferred_element_type=jnp.float32)
    h = jnp.maximum(h + b1_ref[...].astype(jnp.float32), 0.0)

    # Cast hidden back to the weight dtype so the fused head matmul stays on
    # the fast (e.g. bf16) MXU path; accumulation remains f32.
    h = h.astype(wh_ref.dtype)

    # Fused heads: one lane-dense [TB, Np] matmul covering mu || log_var (+ zero pad).
    out = jnp.dot(h, wh_ref[...], preferred_element_type=jnp.float32)
    out = out + bh_ref[...].astype(jnp.float32)
    out_ref[...] = out.astype(out_ref.dtype)


def mlp_encoder_forward(x, params, *, compute_dtype=None, max_batch_tile=512):
    """MLPEncoder forward with a single batch-tiled Pallas kernel.

    Args:
      x: [B, obs_dim] (or higher-rank; flattened like the PyTorch module).
      params: dict with w1 [obs_dim, H], b1 [H], w_mu [H, L], b_mu [L],
              w_lv [H, L], b_lv [L].
      compute_dtype: optional dtype for weights/activations on the MXU
        (e.g. jnp.bfloat16 on v6e/v7x). Accumulation is always f32.
    Returns:
      (mu, log_var), each [B, latent_dim] in the compute dtype.
    """
    if x.ndim > 2:
        x = x.reshape(x.shape[0], -1)

    B, obs_dim = x.shape
    H = params["w1"].shape[1]
    L = params["w_mu"].shape[1]

    cdt = jnp.dtype(compute_dtype) if compute_dtype is not None else jnp.dtype(x.dtype)
    itemsize = cdt.itemsize
    sub_align = max(8, 32 // max(itemsize, 1))  # 8 rows for f32, 16 for bf16

    # Fused + lane-padded head parameters: [H, Np], Np multiple of 128.
    Np = _round_up(2 * L, 128)
    wh = jnp.concatenate([params["w_mu"], params["w_lv"]], axis=1)
    wh = jnp.pad(wh, ((0, 0), (0, Np - 2 * L))).astype(cdt)
    bh = jnp.concatenate([params["b_mu"], params["b_lv"]], axis=0)
    bh = jnp.pad(bh, (0, Np - 2 * L)).reshape(1, Np).astype(cdt)
    w1 = params["w1"].astype(cdt)
    b1 = params["b1"].reshape(1, H).astype(cdt)

    # Batch tile: biggest that fits a conservative VMEM budget.
    # Count resident weights at 2x (pipelining safety) plus 2x-double-buffered
    # activation/output rows.
    vmem_budget = 32 * 1024 * 1024
    resident = 2 * (obs_dim * H + H + H * Np + Np) * itemsize
    per_row = 2 * (obs_dim + Np) * itemsize
    avail = max(vmem_budget - resident, per_row * sub_align)
    tb = (avail // per_row) // sub_align * sub_align
    tb = int(max(sub_align, min(tb, max_batch_tile, _round_up(B, sub_align))))
    # TODO(synk): if resident w1 ([obs_dim, H]) ever exceeds the VMEM budget,
    # add a trailing "arbitrary" K-reduction grid axis with a VMEM accumulator
    # (bias + ReLU moved to the finalize branch).

    Bp = _round_up(B, tb)
    xc = x.astype(cdt)
    if Bp != B:
        xc = jnp.pad(xc, ((0, Bp - B), (0, 0)))

    out = pl.pallas_call(
        _mlp_encoder_kernel,
        out_shape=jax.ShapeDtypeStruct((Bp, Np), cdt),
        grid=(Bp // tb,),
        in_specs=[
            pl.BlockSpec((tb, obs_dim), lambda i: (i, 0)),   # x: tiled over batch
            pl.BlockSpec((obs_dim, H), lambda i: (0, 0)),    # w1: resident
            pl.BlockSpec((1, H), lambda i: (0, 0)),          # b1: resident
            pl.BlockSpec((H, Np), lambda i: (0, 0)),         # fused head weight
            pl.BlockSpec((1, Np), lambda i: (0, 0)),         # fused head bias
        ],
        out_specs=pl.BlockSpec((tb, Np), lambda i: (i, 0)),
        compiler_params=pltpu.CompilerParams(
            dimension_semantics=("parallel",),               # 2 TCs on v7x
            vmem_limit_bytes=48 * 1024 * 1024,
        ),
    )(xc, w1, b1, wh, bh)

    mu = out[:B, :L]
    log_var = out[:B, L:2 * L]
    return mu, log_var


def init_params(key, obs_dim, hidden_dim, latent_dim, dtype=jnp.float32):
    """Deterministic parameter init (shapes mirror nn.Linear layers)."""
    ks = jax.random.split(key, 6)

    def lin(kw, kb, fan_in, fan_out):
        bound = 1.0 / jnp.sqrt(fan_in)
        w = jax.random.uniform(kw, (fan_in, fan_out), dtype, -bound, bound)
        b = jax.random.uniform(kb, (fan_out,), dtype, -bound, bound)
        return w, b

    w1, b1 = lin(ks[0], ks[1], obs_dim, hidden_dim)
    w_mu, b_mu = lin(ks[2], ks[3], hidden_dim, latent_dim)
    w_lv, b_lv = lin(ks[4], ks[5], hidden_dim, latent_dim)
    return {"w1": w1, "b1": b1, "w_mu": w_mu, "b_mu": b_mu,
            "w_lv": w_lv, "b_lv": b_lv}


def _reference(x, params):
    if x.ndim > 2:
        x = x.reshape(x.shape[0], -1)
    h = jnp.maximum(x @ params["w1"] + params["b1"], 0.0)
    mu = h @ params["w_mu"] + params["b_mu"]
    lv = h @ params["w_lv"] + params["b_lv"]
    return mu, lv


if __name__ == "__main__":
    # Small shapes consistent with the module: obs_dim, nhidden, latent_dim.
    B, OBS_DIM, HIDDEN, LATENT = 8, 32, 32, 8

    key = jax.random.PRNGKey(0)
    k_x, k_p = jax.random.split(key)
    x = jax.random.normal(k_x, (B, OBS_DIM), jnp.float32)
    params = init_params(k_p, OBS_DIM, HIDDEN, LATENT)

    # ---- f32 path (tight check) ----
    mu, log_var = mlp_encoder_forward(x, params)
    jax.block_until_ready((mu, log_var))
    mu_ref, lv_ref = _reference(x, params)
    assert mu.shape == (B, LATENT) and log_var.shape == (B, LATENT)
    assert jnp.allclose(mu, mu_ref, atol=1e-5, rtol=1e-5)
    assert jnp.allclose(log_var, lv_ref, atol=1e-5, rtol=1e-5)

    # ---- rank>2 input exercises the flatten path ----
    x3 = x.reshape(B, 4, OBS_DIM // 4)
    mu3, lv3 = mlp_encoder_forward(x3, params)
    jax.block_until_ready((mu3, lv3))
    assert jnp.allclose(mu3, mu_ref, atol=1e-5, rtol=1e-5)
    assert jnp.allclose(lv3, lv_ref, atol=1e-5, rtol=1e-5)

    # ---- bf16 compute path (loose check; f32 accumulation on MXU) ----
    mu_bf, lv_bf = mlp_encoder_forward(x, params, compute_dtype=jnp.bfloat16)
    jax.block_until_ready((mu_bf, lv_bf))
    assert mu_bf.shape == (B, LATENT) and lv_bf.shape == (B, LATENT)
    assert jnp.allclose(mu_bf.astype(jnp.float32), mu_ref, atol=5e-2, rtol=5e-2)
    assert jnp.allclose(lv_bf.astype(jnp.float32), lv_ref, atol=5e-2, rtol=5e-2)

    print("KERNEL_OK")
</pallas_src>

<mosaic_0001>
module attributes {stable_mosaic.version = 11 : i64} {
  func.func @_mlp_encoder_kernel(%arg0: i32, %arg1: memref<8x32xf32, #tpu.memory_space<vmem>>, %arg2: memref<32x32xf32, #tpu.memory_space<vmem>>, %arg3: memref<1x32xf32, #tpu.memory_space<vmem>>, %arg4: memref<32x128xf32, #tpu.memory_space<vmem>>, %arg5: memref<1x128xf32, #tpu.memory_space<vmem>>, %arg6: memref<8x128xf32, #tpu.memory_space<vmem>>) attributes {dimension_semantics = [#tpu.dimension_semantics<parallel>], iteration_bounds = array<i64: 1>, scalar_prefetch = 0 : i64, scratch_operands = 0 : i64, tpu.core_type = #tpu.core_type<tc>, window_params = [{transform_indices = @transform_0, window_bounds = array<i64: 8, 32>}, {pipeline_mode = #tpu.pipeline_mode<synchronous>, transform_indices = @transform_1, window_bounds = array<i64: 32, 32>}, {pipeline_mode = #tpu.pipeline_mode<synchronous>, transform_indices = @transform_2, window_bounds = array<i64: 1, 32>}, {pipeline_mode = #tpu.pipeline_mode<synchronous>, transform_indices = @transform_3, window_bounds = array<i64: 32, 128>}, {pipeline_mode = #tpu.pipeline_mode<synchronous>, transform_indices = @transform_4, window_bounds = array<i64: 1, 128>}, {transform_indices = @transform_5, window_bounds = array<i64: 8, 128>}]} {
    %c0 = arith.constant 0 : index
    %c0_0 = arith.constant 0 : index
    %0 = vector.load %arg1[%c0, %c0_0] : memref<8x32xf32, #tpu.memory_space<vmem>>, vector<8x32xf32>
    %c0_1 = arith.constant 0 : index
    %c0_2 = arith.constant 0 : index
    %1 = vector.load %arg2[%c0_1, %c0_2] : memref<32x32xf32, #tpu.memory_space<vmem>>, vector<32x32xf32>
    %cst = arith.constant dense<0.000000e+00> : vector<8x32xf32>
    %2 = tpu.matmul %0, %1, %cst {dimension_numbers = #tpu.dot_dimension_numbers<[1], [0], [0], [1], [0, 0, 1, 1], [], []>} : vector<8x32xf32>, vector<32x32xf32>, vector<8x32xf32> -> vector<8x32xf32>
    %c0_3 = arith.constant 0 : index
    %c0_4 = arith.constant 0 : index
    %3 = vector.load %arg3[%c0_3, %c0_4] : memref<1x32xf32, #tpu.memory_space<vmem>>, vector<1x32xf32>
    %4 = vector.broadcast %3 : vector<1x32xf32> to vector<8x32xf32>
    %5 = arith.addf %2, %4 : vector<8x32xf32>
    %cst_5 = arith.constant 0.000000e+00 : f32
    %6 = vector.broadcast %cst_5 : f32 to vector<8x32xf32>
    %7 = arith.maximumf %5, %6 : vector<8x32xf32>
    %c0_6 = arith.constant 0 : index
    %c0_7 = arith.constant 0 : index
    %8 = vector.load %arg4[%c0_6, %c0_7] : memref<32x128xf32, #tpu.memory_space<vmem>>, vector<32x128xf32>
    %cst_8 = arith.constant dense<0.000000e+00> : vector<8x128xf32>
    %9 = tpu.matmul %7, %8, %cst_8 {dimension_numbers = #tpu.dot_dimension_numbers<[1], [0], [0], [1], [0, 0, 1, 1], [], []>} : vector<8x32xf32>, vector<32x128xf32>, vector<8x128xf32> -> vector<8x128xf32>
    %c0_9 = arith.constant 0 : index
    %c0_10 = arith.constant 0 : index
    %10 = vector.load %arg5[%c0_9, %c0_10] : memref<1x128xf32, #tpu.memory_space<vmem>>, vector<1x128xf32>
    %11 = vector.broadcast %10 : vector<1x128xf32> to vector<8x128xf32>
    %12 = arith.addf %9, %11 : vector<8x128xf32>
    %c0_11 = arith.constant 0 : index
    %c0_12 = arith.constant 0 : index
    %13 = vector.load %arg6[%c0_11, %c0_12] : memref<8x128xf32, #tpu.memory_space<vmem>>, vector<8x128xf32>
    tpu.vector_store %arg6[%c0_11, %c0_12], %12 {strides = array<i32>} : memref<8x128xf32, #tpu.memory_space<vmem>>, vector<8x128xf32>,
    return
  }
  func.func @transform_0(%arg0: i32) -> (i32, i32) {
    %c0_i32 = arith.constant 0 : i32
    %c0_i32_0 = arith.constant 0 : i32
    return %arg0, %c0_i32 : i32, i32
  }
  func.func @transform_1(%arg0: i32) -> (i32, i32) {
    %c0_i32 = arith.constant 0 : i32
    %c0_i32_0 = arith.constant 0 : i32
    %c0_i32_1 = arith.constant 0 : i32
    return %c0_i32, %c0_i32_0 : i32, i32
  }
  func.func @transform_2(%arg0: i32) -> (i32, i32) {
    %c0_i32 = arith.constant 0 : i32
    %c0_i32_0 = arith.constant 0 : i32
    %c0_i32_1 = arith.constant 0 : i32
    return %c0_i32, %c0_i32_0 : i32, i32
  }
  func.func @transform_3(%arg0: i32) -> (i32, i32) {
    %c0_i32 = arith.constant 0 : i32
    %c0_i32_0 = arith.constant 0 : i32
    %c0_i32_1 = arith.constant 0 : i32
    return %c0_i32, %c0_i32_0 : i32, i32
  }
  func.func @transform_4(%arg0: i32) -> (i32, i32) {
    %c0_i32 = arith.constant 0 : i32
    %c0_i32_0 = arith.constant 0 : i32
    %c0_i32_1 = arith.constant 0 : i32
    return %c0_i32, %c0_i32_0 : i32, i32
  }
  func.func @transform_5(%arg0: i32) -> (i32, i32) {
    %c0_i32 = arith.constant 0 : i32
    %c0_i32_0 = arith.constant 0 : i32
    return %arg0, %c0_i32 : i32, i32
  }
}

</mosaic_0001>

<bundles_post_ra>
// kernel: tpu_custom_call.1
= control target key start
LH: loop header
LB: loop body
LE: loop exit
PB: predicated region body
PF: predicated region fallthrough
CT: control target
= control target key end

     0   :  { %10 = vsyncpa [#allocation3], 0  ;;  %s498_s0 = inlined_call_operand.hbm [shape: f32[8,32], index: 0, kind: input, shape index: {}]   ;;  %s499_s1 = inlined_call_operand.hbm [shape: f32[32,32], index: 1, kind: input, shape index: {}]   ;;  %s500_s2 = inlined_call_operand.vmem [shape: f32[1,32], index: 2, kind: input, shape index: {}]   ;;  %s501_s3 = inlined_call_operand.hbm [shape: f32[32,128], index: 3, kind: input, shape index: {}]   ;;  %s502_s4 = inlined_call_operand.vmem [shape: f32[1,128], index: 4, kind: input, shape index: {}]   ;;  %s503_s5 = inlined_call_operand.hbm [shape: f32[8,128], index: 5, kind: output, shape index: {}]  }
   0x1   :  { %11 = vsyncpa [#allocation6], 0 }
   0x2   :  { %12 = vsyncpa [#allocation4], 0  ;;  %s399_s18 = smov [#allocation5]   ;;  %s305_s22 = scalar_lea.hbm %s499_s1, 512 }
   0x3   :  { %s28_s19 = sshll.u32 %s399_s18, 4  ;;  %p306_p0 = scmp.ne.s32.totalorder %s499_s1, %s305_s22  ;;  %s29_s19 = int_to_ptr.vmem [resolvable:$true] %s28_s19 }
   0x4   :  { %p309_p1 = scmp.lt.u32.totalorder %s305_s22, %s499_s1 }
   0x6   :  { %p311_p2 = pnand %p309_p1, %p306_p0 }
   0x8   :  { %314 = shalt.err (!%p311_p2)
}
   0x9   :  { %s315_s27 = scalar_lea.vmem %s29_s19, 512  ;;  %p320_p4 = scmp.lt.s32.totalorder %s29_s19, %s29_s19 }
   0xa   :  { %p316_p3 = scmp.ne.s32.totalorder %s29_s19, %s315_s27  ;;  %p321_p5 = scmp.lt.s32.totalorder %s315_s27, %s315_s27 }
   0xc   :  { %p322_p6 = por %p321_p5, %p320_p4 }
   0xe   :  { %p323_p7 = pnand %p322_p6, %p316_p3 }
  0x10   :  { %326 = shalt.err (!%p323_p7)
}
  0x11   :  { %s400_s28 = smov 128   ;;  %s401_s29 = smov 8  }
  0x12   :  { %34 = dma.hbm_to_vmem [thread:$0]  %s499_s1, 512, %s29_s19, [#allocation6], %s400_s28, %s400_s28, %s401_s29  }
  0x13   :  { %s402_s7 = smov [#allocation2]   ;;  %s403_s9 = smov [#allocation7]  }
  0x14   :  { %s19_s8 = sshll.u32 %s402_s7, 4  ;;  %s42_s10 = sshll.u32 %s403_s9, 4  ;;  %s20_s8 = int_to_ptr.vmem [resolvable:$true] %s19_s8  ;;  %s43_s10 = int_to_ptr.vmem [resolvable:$true] %s42_s10 }
  0x15   :  { %s327_s13 = scalar_lea.hbm %s498_s0, 128 }
  0x16   :  { %p328_p8 = scmp.ne.s32.totalorder %s498_s0, %s327_s13  ;;  %p331_p9 = scmp.lt.u32.totalorder %s327_s13, %s498_s0 }
  0x18   :  { %p333_p10 = pnand %p331_p9, %p328_p8 }
  0x1a   :  { %336 = shalt.err (!%p333_p10)
}
  0x1b   :  { %s337_s1 = scalar_lea.vmem %s20_s8, 128  ;;  %p342_p12 = scmp.lt.s32.totalorder %s20_s8, %s20_s8 }
  0x1c   :  { %p338_p11 = scmp.ne.s32.totalorder %s20_s8, %s337_s1  ;;  %p343_p13 = scmp.lt.s32.totalorder %s337_s1, %s337_s1 }
  0x1e   :  { %p344_p0 = por %p343_p13, %p342_p12 }
  0x20   :  { %p345_p1 = pnand %p344_p0, %p338_p11 }
  0x22   :  { %348 = shalt.err (!%p345_p1)
}
  0x23   :  { %22 = dma.hbm_to_vmem [thread:$0]  %s498_s0, 128, %s20_s8, [#allocation3]  }
  0x24   :  { %s349_s22 = scalar_lea.hbm %s501_s3, 512 }
  0x25   :  { %p350_p2 = scmp.ne.s32.totalorder %s501_s3, %s349_s22  ;;  %p353_p3 = scmp.lt.u32.totalorder %s349_s22, %s501_s3 }
  0x27   :  { %p355_p4 = pnand %p353_p3, %p350_p2 }
  0x29   :  { %358 = shalt.err (!%p355_p4)
}
  0x2a   :  { %s359_s27 = scalar_lea.vmem %s43_s10, 512  ;;  %p364_p6 = scmp.lt.s32.totalorder %s43_s10, %s43_s10 }
  0x2b   :  { %p360_p5 = scmp.ne.s32.totalorder %s43_s10, %s359_s27  ;;  %p365_p7 = scmp.lt.s32.totalorder %s359_s27, %s359_s27 }
  0x2d   :  { %p366_p8 = por %p365_p7, %p364_p6 }
  0x2f   :  { %p367_p9 = pnand %p366_p8, %p360_p5 }
  0x31   :  { %370 = shalt.err (!%p367_p9)
}
  0x32   :  { %48 = dma.hbm_to_vmem [thread:$0]  %s501_s3, 512, %s43_s10, [#allocation6], %s400_s28, %s400_s28, %s401_s29  }
  0x33   :  { %393 = dma.done.wait [#allocation3], 128  }
  0x34   :  { %394 = vsyncadd [#allocation3], 4294967168 }
  0x35   :  { %395 = dma.done.wait [#allocation6], 1024  }
  0x36   :  { %396 = vsyncadd [#allocation6], 4294966272  ;;  %v404_v0 = vmov 0.0|0.0   ;;  %vm405_vm0 = vmmov 0   ;;  %v406_v1 = vmov 0.0   ;;  %v61_v2 = vld [vmem:[#allocation5] sm:$0xff] }
  0x37   :  { %284 = vmatprep.subr.bf16.mxu0 %v404_v0  ;;  %270 = vmatprep.mubr.msk.f32.mxu0 %vm405_vm0, %v406_v1  ;;  %v62_v3 = vld [vmem:[#allocation5 + $0x8] sm:$0xff]  ;;  %v63_v4 = vld [vmem:[#allocation5 + $0x10] sm:$0xff]  ;;  %v64_v6 = vld [vmem:[#allocation5 + $0x18] sm:$0xff]  ;;  %vm72_vm1 = vcmask 261120   ;;  %s407_s7 = smov [#allocation8]  }
  0x38   :  { %290 = vmatprep.subr.bf16.mxu1 %v404_v0  ;;  %281 = vmatprep.mubr.msk.f32.mxu1 %vm405_vm0, %v406_v1  ;;  %v285_v5 = vpack.c.bf16 %v62_v3, %v61_v2  ;;  %v147_v7 = vld [vmem:[#allocation7] sm:$0xff]  ;;  %v148_v8 = vld [vmem:[#allocation7 + $0x8] sm:$0xff]  ;;  %v288_v9 = vpack.c.bf16 %v64_v6, %v63_v4  ;;  %v60_v11 = vld [vmem:[#allocation2] sm:$0xff]  ;;  %s238_s8 = sshll.u32 %s407_s7, 4  ;;  %s239_s8 = int_to_ptr.vmem [resolvable:$true] %s238_s8 }
  0x39   :  { %v291_v10 = vpack.c.bf16 %v148_v8, %v147_v7  ;;  %v149_v12 = vld [vmem:[#allocation7 + $0x10] sm:$0xff]  ;;  %v150_v13 = vld [vmem:[#allocation7 + $0x18] sm:$0xff]  ;;  %s371_s9 = scalar_lea.vmem %s239_s8, 128  ;;  %p376_p11 = scmp.lt.s32.totalorder %s239_s8, %s239_s8 }
  0x3a   :  { %286 = vmatpush3.bf16.msra.mxu0 %v285_v5  ;;  %v294_v14 = vpack.c.bf16 %v150_v13, %v149_v12  ;;  %v248_v15 = vld [vmem:[%s500_s2] ss:$0 sm:$0xff]  ;;  %p372_p10 = scmp.ne.s32.totalorder %s239_s8, %s371_s9  ;;  %p377_p12 = scmp.lt.s32.totalorder %s371_s9, %s371_s9 }
  0x3b   :  { %287 = vmatprep.subr.bf16.mxu0 %v404_v0  ;;  %292 = vmatpush3.bf16.msra.mxu1 %v291_v10  ;;  %v250_v20 = vld [vmem:[%s502_s4] ss:$0 sm:$0xff] }
  0x3c   :  { %293 = vmatprep.subr.bf16.mxu1 %v404_v0  ;;  %p378_p13 = por %p377_p12, %p376_p11 }
  0x3e   :  { %289 = vmatpush3.bf16.msra.mxu0 %v288_v9  ;;  %p379_p0 = pnand %p378_p13, %p372_p10 }
  0x3f   :  { %295 = vmatpush3.bf16.msra.mxu1 %v294_v14 }
  0x41   :  { %271 = vmatmul.mubr.msk.f32.vlgmr.msra.gmra.mrb[0].mxu0 %vm72_vm1, %v60_v11 }
 0x114   :  { %v142_v16 = vpop.f32.mrb[0].mxu0 }
 0x115   :  { %v143_v17 = vadd.f32 %v248_v15, %v142_v16  ;;  %v272_v18 = vpop.f32.mrb[1].mxu0 }
 0x117   :  { %v146_v19 = vmax.f32 %v143_v17, 0.0 }
 0x119   :  { %282 = vmatmul.mubr.msk.f32.vlgmr.msra.gmra.mrb[0].mxu1 %vm72_vm1, %v146_v19 }
 0x1ec   :  { %v227_v21 = vpop.f32.mrb[0].mxu1 }
 0x1ed   :  { %v228_v22 = vadd.f32 %v250_v20, %v227_v21  ;;  %v283_v23 = vpop.f32.mrb[1].mxu1 }
 0x1ef   :  { %231 = vst [vmem:[#allocation8] sm:$0xff] %v228_v22 }
 0x1f0   :  { %382 = shalt.err (!%p379_p0)
}
 0x1f1   :  { %s383_s11 = scalar_lea.hbm %s503_s5, 128 }
 0x1f2   :  { %p384_p1 = scmp.ne.s32.totalorder %s503_s5, %s383_s11  ;;  %p387_p2 = scmp.lt.u32.totalorder %s383_s11, %s503_s5 }
 0x1f4   :  { %p389_p3 = pnand %p387_p2, %p384_p1 }
 0x1f6   :  { %392 = shalt.err (!%p389_p3)
}
 0x1f7   :  { %241 = dma.vmem_to_hbm [thread:$0]  %s239_s8, 128, %s503_s5, [#allocation4]  }
 0x1f8   :  { %397 = dma.done.wait [#allocation4], 128  }
 0x1f9   :  { %398 = vsyncadd [#allocation4], 4294967168 }
 0x1fa   :  { %245 = vsyncpa [#allocation3], 1 }
 0x1fb   :  { %246 = vsyncpa [#allocation6], 1 }
 0x1fc   :  { %247 = vsyncpa [#allocation4], 1 }

</bundles_post_ra>
